<compile_context>
chip_gen: v7x
topology: tpu7x:2x2x1
jax: 0.10.0
libtpu: 0.0.40
codegen_flags: <defaults>
</compile_context>

<pallas_src>
import jax
import jax.numpy as jnp
from jax.experimental import pallas as pl
from jax.experimental.pallas import tpu as pltpu


def _scse_kernel(x_ref, c_ref, ws_ref, bs_ref, o_ref):
    """Blocks: x/o (1, C, T); c_scale (1, C, 1); ws (1, C); bs (1, 1) in SMEM."""
    x = x_ref[0]                                                  # (C, T)

    # sSE: 1x1 conv to a single channel == (1, C) @ (C, T) matmul + bias.
    s_logit = jnp.dot(ws_ref[...].astype(jnp.float32),
                      x.astype(jnp.float32),
                      preferred_element_type=jnp.float32) + bs_ref[0, 0]   # (1, T)
    s_scale = 1.0 / (1.0 + jnp.exp(-s_logit))                     # sigmoid, (1, T)

    # Fused combine: x*cSE + x*sSE == x * (cSE + sSE).
    # c_ref[0] is (C, 1) f32, s_scale is (1, T) f32 -> broadcast add to (C, T).
    scale = (c_ref[0] + s_scale).astype(x.dtype)
    o_ref[0] = x * scale


def _pick_spatial_tile(hw, c, itemsize, target_bytes=2 * 1024 * 1024):
    """Largest multiple-of-128 divisor of hw with C*T*itemsize <= target_bytes."""
    if hw % 128 != 0:
        return hw            # block last-dim must equal the full dim in this case
    max_lanes = max(128, ((target_bytes // (c * itemsize)) // 128) * 128)
    best = 128
    t = 128
    limit = min(hw, max_lanes)
    while t <= limit:
        if hw % t == 0:
            best = t
        t += 128
    return best


def scse_forward(x_nchw, params):
    """x_nchw: (N, C, H, W). params: see init_params. Returns (N, C, H, W)."""
    N, C, H, W = x_nchw.shape
    HW = H * W
    x = x_nchw.reshape(N, C, HW)                                   # pure reshape

    # ---- cSE branch (tiny; plain JAX): global pool + MLP + sigmoid ----
    pooled = jnp.mean(x.astype(jnp.float32), axis=2)               # (N, C)
    h = jnp.maximum(pooled @ params["w1"] + params["b1"], 0.0)     # (N, mid)
    c_scale = jax.nn.sigmoid(h @ params["w2"] + params["b2"])      # (N, C)
    c_scale = c_scale[:, :, None].astype(jnp.float32)              # (N, C, 1)

    T = _pick_spatial_tile(HW, C, x.dtype.itemsize)
    n_t = HW // T

    out = pl.pallas_call(
        _scse_kernel,
        out_shape=jax.ShapeDtypeStruct((N, C, HW), x.dtype),
        grid_spec=pltpu.PrefetchScalarGridSpec(
            num_scalar_prefetch=0,
            grid=(N, n_t),
            in_specs=[
                pl.BlockSpec((1, C, T), lambda b, t: (b, 0, t)),     # x tile
                pl.BlockSpec((1, C, 1), lambda b, t: (b, 0, 0)),     # c_scale
                pl.BlockSpec((1, C), lambda b, t: (0, 0)),           # ws
                pl.BlockSpec(memory_space=pltpu.MemorySpace.SMEM),   # bs scalar
            ],
            out_specs=pl.BlockSpec((1, C, T), lambda b, t: (b, 0, t)),
        ),
        compiler_params=pltpu.CompilerParams(
            dimension_semantics=("parallel", "parallel")),
    )(x, c_scale, params["ws"], params["bs"])

    return out.reshape(N, C, H, W)


def scse_reference(x_nchw, params):
    """Plain-JAX reference matching the PyTorch forward (NCHW)."""
    x = x_nchw.astype(jnp.float32)
    pooled = jnp.mean(x, axis=(2, 3))                                       # (N, C)
    h = jnp.maximum(pooled @ params["w1"] + params["b1"], 0.0)              # (N, mid)
    cse = jax.nn.sigmoid(h @ params["w2"] + params["b2"])                   # (N, C)
    sse = jax.nn.sigmoid(
        jnp.einsum("nchw,c->nhw", x, params["ws"][0]) + params["bs"][0, 0])  # (N,H,W)
    out = x * cse[:, :, None, None] + x * sse[:, None, :, :]
    return out.astype(x_nchw.dtype)


def init_params(key, in_channels, reduction=16):
    mid = in_channels // reduction
    k1, k2, k3, k4, k5, k6 = jax.random.split(key, 6)
    # Conv2d 1x1 weights (PyTorch (out,in,1,1)) stored transposed as (in,out)
    # so 1x1 conv == right-matmul in channels-last math; ws kept as (1, C) so
    # the in-kernel sSE conv is a (1,C)@(C,T) matmul.
    return {
        "w1": jax.random.normal(k1, (in_channels, mid), jnp.float32) * 0.1,
        "b1": jax.random.normal(k2, (mid,), jnp.float32) * 0.1,
        "w2": jax.random.normal(k3, (mid, in_channels), jnp.float32) * 0.1,
        "b2": jax.random.normal(k4, (in_channels,), jnp.float32) * 0.1,
        "ws": jax.random.normal(k5, (1, in_channels), jnp.float32) * 0.1,
        "bs": jax.random.normal(k6, (1, 1), jnp.float32) * 0.1,
    }


if __name__ == "__main__":
    key = jax.random.PRNGKey(0)
    kx, kp = jax.random.split(key)

    N, C, H, W = 2, 32, 16, 16        # reduction=16 -> mid channels = 2
    x = jax.random.normal(kx, (N, C, H, W), jnp.float32)
    params = init_params(kp, in_channels=C, reduction=16)

    out = jax.block_until_ready(scse_forward(x, params))
    ref = scse_reference(x, params)

    assert out.shape == (N, C, H, W)
    assert jnp.allclose(out, ref, atol=1e-4, rtol=1e-4), "mismatch vs reference"

    print("KERNEL_OK")
</pallas_src>

<mosaic_0001>
module attributes {stable_mosaic.version = 11 : i64} {
  func.func @_scse_kernel(%arg0: i32, %arg1: i32, %arg2: memref<1x32x256xf32, #tpu.memory_space<vmem>>, %arg3: memref<1x32x1xf32, #tpu.memory_space<vmem>>, %arg4: memref<1x32xf32, #tpu.memory_space<vmem>>, %arg5: memref<1x1xf32, #tpu.memory_space<smem>>, %arg6: memref<1x32x256xf32, #tpu.memory_space<vmem>>) attributes {dimension_semantics = [#tpu.dimension_semantics<parallel>, #tpu.dimension_semantics<parallel>], iteration_bounds = array<i64: 2, 1>, scalar_prefetch = 0 : i64, scratch_operands = 0 : i64, tpu.core_type = #tpu.core_type<tc>, window_params = [{transform_indices = @transform_0, window_bounds = array<i64: 1, 32, 256>}, {transform_indices = @transform_1, window_bounds = array<i64: 1, 32, 1>}, {pipeline_mode = #tpu.pipeline_mode<synchronous>, transform_indices = @transform_2, window_bounds = array<i64: 1, 32>}, {transform_indices = @transform_3, window_bounds = array<i64: 1, 1>}, {transform_indices = @transform_4, window_bounds = array<i64: 1, 32, 256>}]} {
    %c0 = arith.constant 0 : index
    %c0_0 = arith.constant 0 : index
    %c0_1 = arith.constant 0 : index
    %0 = vector.load %arg2[%c0, %c0_0, %c0_1] : memref<1x32x256xf32, #tpu.memory_space<vmem>>, vector<1x32x256xf32>
    %1 = vector.shape_cast %0 : vector<1x32x256xf32> to vector<32x256xf32>
    %c0_2 = arith.constant 0 : index
    %c0_3 = arith.constant 0 : index
    %2 = vector.load %arg4[%c0_2, %c0_3] : memref<1x32xf32, #tpu.memory_space<vmem>>, vector<1x32xf32>
    %cst = arith.constant dense<0.000000e+00> : vector<1x256xf32>
    %3 = tpu.matmul %2, %1, %cst {dimension_numbers = #tpu.dot_dimension_numbers<[1], [0], [0], [1], [0, 0, 1, 1], [], []>} : vector<1x32xf32>, vector<32x256xf32>, vector<1x256xf32> -> vector<1x256xf32>
    %c0_4 = arith.constant 0 : index
    %c0_5 = arith.constant 0 : index
    %4 = memref.load %arg5[%c0_4, %c0_5] : memref<1x1xf32, #tpu.memory_space<smem>>
    %5 = vector.broadcast %4 : f32 to vector<1x256xf32>
    %6 = arith.addf %3, %5 : vector<1x256xf32>
    %cst_6 = arith.constant 0.000000e+00 : f32
    %7 = vector.broadcast %cst_6 : f32 to vector<1x256xf32>
    %8 = arith.subf %7, %6 : vector<1x256xf32>
    %9 = math.exp %8 : vector<1x256xf32>
    %cst_7 = arith.constant 1.000000e+00 : f32
    %10 = vector.broadcast %cst_7 : f32 to vector<1x256xf32>
    %11 = arith.addf %10, %9 : vector<1x256xf32>
    %cst_8 = arith.constant 1.000000e+00 : f32
    %12 = vector.broadcast %cst_8 : f32 to vector<1x256xf32>
    %13 = arith.divf %12, %11 : vector<1x256xf32>
    %c0_9 = arith.constant 0 : index
    %c0_10 = arith.constant 0 : index
    %c0_11 = arith.constant 0 : index
    %14 = vector.load %arg3[%c0_9, %c0_10, %c0_11] : memref<1x32x1xf32, #tpu.memory_space<vmem>>, vector<1x32x1xf32>
    %15 = vector.shape_cast %14 : vector<1x32x1xf32> to vector<32x1xf32>
    %16 = vector.broadcast %15 : vector<32x1xf32> to vector<32x256xf32>
    %17 = vector.broadcast %13 : vector<1x256xf32> to vector<32x256xf32>
    %18 = arith.addf %16, %17 : vector<32x256xf32>
    %19 = arith.mulf %1, %18 : vector<32x256xf32>
    %c0_12 = arith.constant 0 : index
    %c0_13 = arith.constant 0 : index
    %c0_14 = arith.constant 0 : index
    %20 = vector.load %arg6[%c0_12, %c0_13, %c0_14] : memref<1x32x256xf32, #tpu.memory_space<vmem>>, vector<1x32x256xf32>
    %21 = vector.shape_cast %20 : vector<1x32x256xf32> to vector<32x256xf32>
    %22 = vector.shape_cast %19 : vector<32x256xf32> to vector<1x32x256xf32>
    tpu.vector_store %arg6[%c0_12, %c0_13, %c0_14], %22 {strides = array<i32>} : memref<1x32x256xf32, #tpu.memory_space<vmem>>, vector<1x32x256xf32>,
    return
  }
  func.func @transform_0(%arg0: i32, %arg1: i32) -> (i32, i32, i32) {
    %c0_i32 = arith.constant 0 : i32
    %c0_i32_0 = arith.constant 0 : i32
    return %arg0, %c0_i32, %arg1 : i32, i32, i32
  }
  func.func @transform_1(%arg0: i32, %arg1: i32) -> (i32, i32, i32) {
    %c0_i32 = arith.constant 0 : i32
    %c0_i32_0 = arith.constant 0 : i32
    %c0_i32_1 = arith.constant 0 : i32
    return %arg0, %c0_i32, %c0_i32_0 : i32, i32, i32
  }
  func.func @transform_2(%arg0: i32, %arg1: i32) -> (i32, i32) {
    %c0_i32 = arith.constant 0 : i32
    %c0_i32_0 = arith.constant 0 : i32
    %c0_i32_1 = arith.constant 0 : i32
    return %c0_i32, %c0_i32_0 : i32, i32
  }
  func.func @transform_3(%arg0: i32, %arg1: i32) -> (i32, i32) {
    %c0_i32 = arith.constant 0 : i32
    %c0_i32_0 = arith.constant 0 : i32
    %c0_i32_1 = arith.constant 0 : i32
    return %c0_i32, %c0_i32_0 : i32, i32
  }
  func.func @transform_4(%arg0: i32, %arg1: i32) -> (i32, i32, i32) {
    %c0_i32 = arith.constant 0 : i32
    %c0_i32_0 = arith.constant 0 : i32
    return %arg0, %c0_i32, %arg1 : i32, i32, i32
  }
}

</mosaic_0001>

<bundles_post_ra>
// kernel: tpu_custom_call.1
= control target key start
LH: loop header
LB: loop body
LE: loop exit
PB: predicated region body
PF: predicated region fallthrough
CT: control target
= control target key end

     0   :  { %s994_s0 = inlined_call_operand.hbm [shape: f32[2,32,256], index: 0, kind: input, shape index: {}]   ;;  %s995_s1 = inlined_call_operand.vmem [shape: f32[2,32,1], index: 1, kind: input, shape index: {}]   ;;  %s996_s2 = inlined_call_operand.vmem [shape: f32[1,32], index: 2, kind: input, shape index: {}]   ;;  %s997_s3 = inlined_call_operand.<no memory space> [shape: f32[1,1], index: 3, kind: input, shape index: {}]   ;;  %s998_s4 = inlined_call_operand.hbm [shape: f32[2,32,256], index: 4, kind: output, shape index: {}]  }
   0x1   :  { %9 = sst [smem:[#allocation2]] %s997_s3 }
   0x2   :  { %10 = vsyncpa [#allocation4], 0 }
   0x3   :  { %12 = vsyncpa [#allocation4 + $0x1], 0 }
   0x4   :  { %13 = vsyncpa [#allocation5], 0 }
   0x5   :  { %15 = vsyncpa [#allocation5 + $0x1], 0  ;;  %s783_s17 = smov 0   ;;  %s785_s18 = smov 0  }
   0x6   :  { %s787_s19 = smov 0   ;;  %s789_s20 = smov 0  }
   0x7   :  { %s791_s21 = smov 0   ;;  %s793_s22 = smov 0  }
   0x8 LB: > { %s526_s3 = sadd.s32 4294967295, %s745_s22   ;;  %s527_s23 = sadd.s32 4294967294, %s745_s22   ;;  %s745_s22 = sphi %s793_s22, %s21_s22   ;;  %s741_s21 = sphi %s791_s21, %s1013_s21   ;;  %s737_s20 = sphi %s789_s20, %s1012_s20   ;;  %s733_s19 = sphi %s787_s19, %s1011_s19   ;;  %s729_s18 = sphi %s785_s18, %s1010_s18   ;;  %s725_s17 = sphi %s783_s17, %s1009_s17  }
   0x9   : > { %s33_s24 = sadd.s32 1, %s741_s21  ;;  %s42_s25 = sadd.s32 1, %s733_s19 }
   0xa   : > { %p35_p0 = scmp.ge.s32.totalorder %s33_s24, 2  ;;  %p49_p1 = scmp.ne.s32.totalorder %s733_s19, %s729_s18 }
   0xb   : > { %p50_p2 = scmp.eq.s32.totalorder %s745_s22, 0  ;;  %p55_p3 = scmp.ne.s32.totalorder %s729_s18, %s725_s17 }
   0xc   : > { %s1015_s24 = smov (%p35_p0, %s33_s24), 0  ;;  %p56_p5 = scmp.eq.s32.totalorder %s526_s3, 0 }
   0xd   : > { %p824_p4 = por %p50_p2, %p49_p1  ;;  %s37_s27 = ssub.s32 %s741_s21, %s1015_s24 }
   0xe   : > { %p149_p6 = scmp.eq.s32.totalorder %s526_s3, 1  ;;  %p40_p7 = scmp.eq.s32.totalorder %s37_s27, 0 }
   0xf   : > { %p830_p8 = por %p56_p5, %p55_p3  ;;  %p155_p10 = scmp.eq.s32.totalorder %s527_s23, 1 }
  0x10   : > { %p834_p9 = por %p149_p6, %p49_p1  ;;  %p567_p13 = scmp.lt.s32.totalorder %s745_s22, 2 }
  0x11   : > { %s839_s30 = scalar_select %p40_p7, %s733_s19, %s42_s25  }
  0x12   : > { %s1002_s29 = scalar_select %p834_p9, 1, 0 }
  0x13   : > { %p841_p11 = por %p155_p10, %p55_p3  ;;  %s181_s6 = sand.u32 1, %s733_s19  }
  0x14   : > { %s530_s7 = sshll.u32 %s181_s6, 6  ;;  %s544_s8 = sshll.u32 %s741_s21, 10 }
  0x15   : > { %s1003_s5 = scalar_select %p841_p11, 1, 0 }
  0x16   : > { %s852_s11 = scalar_lea.hbm %s994_s0, %s544_s8  ;;  %s185_s12 = scalar_lea.vmem [#allocation3], %s530_s7 }
  0x17   : > { %s194_s13 = sshll.u32 %s185_s12, 4  ;;  %p858_p0 = pnand %p567_p13, %p824_p4  ;;  %s854_s13 = int_to_ptr.vmem [resolvable:$true] %s194_s13 }
  0x18   : > { %s863_s15 = scalar_lea.sflag [#allocation4], %s181_s6  ;;  %s633_s16 = scalar_lea.hbm %s852_s11, 1024 }
  0x19   : > { %p634_p2 = scmp.ne.s32.totalorder %s852_s11, %s633_s16  ;;  %p635_p3 = pneg %p858_p0 }
  0x1a   : > { %s638_s25 = scalar_lea.hbm %s994_s0, 2048  ;;  %p639_p4 = scmp.lt.u32.totalorder %s852_s11, %s994_s0 }
  0x1b   : > { %p636_p5 = pnand %p635_p3, %p634_p2  ;;  %p640_p7 = scmp.lt.u32.totalorder %s638_s25, %s633_s16 }
  0x1c   : > { %p642_p13 = scmp.lt.u32.totalorder %s633_s16, %s852_s11 }
  0x1d   : > { %p637_p6 = pneg %p636_p5  ;;  %p641_p10 = por %p640_p7, %p639_p4 }
  0x1f   : > { %p643_p12 = por %p642_p13, %p641_p10 }
  0x21   : > { %p644_p1 = pnand %p643_p12, %p637_p6 }
  0x23   : > { %647 = shalt.err (!%p644_p1)
}
  0x24   : > { %s648_s6 = scalar_lea.vmem %s854_s13, 1024  ;;  %s747_s7 = smov [#allocation3]  }
  0x25   : > { %p649_p2 = scmp.ne.s32.totalorder %s854_s13, %s648_s6  ;;  %s653_s8 = sshll.u32 %s747_s7, 4  ;;  %s654_s8 = int_to_ptr.vmem [resolvable:$false] %s653_s8 }
  0x26   : > { %s655_s9 = scalar_lea.vmem %s654_s8, 2048  ;;  %p656_p9 = scmp.lt.s32.totalorder %s854_s13, %s654_s8 }
  0x27   : > { %p651_p5 = pnand %p649_p2, %p635_p3  ;;  %p657_p4 = scmp.lt.s32.totalorder %s655_s9, %s648_s6 }
  0x29   : > { %p652_p11 = pneg %p651_p5  ;;  %p658_p7 = por %p657_p4, %p656_p9 }
  0x2b   : > { %p659_p10 = pnand %p658_p7, %p652_p11 }
  0x2d   : > { %662 = shalt.err (!%p659_p10)
}
  0x2e   : > { %s748_s10 = smov 256   ;;  %s749_s12 = smov 16  }
  0x2f   : > { %562 = dma.hbm_to_vmem [thread:$0]  (!%p858_p0), %s852_s11, 1024, %s854_s13, %s863_s15, %s748_s10, %s748_s10, %s749_s12  }
  0x30   : > { %p210_p12 = scmp.lt.s32.totalorder %s745_s22, 3  ;;  %p1005_p1 = scmp.ge.s32.totalorder %s745_s22, 1 }
  0x32   : > { %p211_p3 = pnand %p1005_p1, %p210_p12 }
  0x33   : > { %s895_s16 = sand.u32 (!%p211_p3), 1, %s729_s18  }
  0x34   : > { %214 = sbr.rel (%p211_p3) target bundleno = 338 (0x152), region = 36  ;;  %s534_s3 = sshll.u32 (!%p211_p3), %s895_s16, 6 }
  0x35   : > { %s217_s23 = scalar_lea.sflag (!%p211_p3), [#allocation4], %s895_s16  ;;  %s220_s25 = scalar_lea.vmem (!%p211_p3), [#allocation3], %s534_s3 }
  0x3b   : > { %716 = dma.done.wait (%p830_p8), %s217_s23, 1024  }
  0x3c   : > { %718 = vsyncadd (%p830_p8), %s217_s23, 4294966272  ;;  %p251_p9 = scmp.lt.s32.totalorder %s737_s20, 1  ;;  %v750_v0 = vmov 0.0   ;;  %v751_v1 = vmov 0   ;;  %v907_v2 = vld [vmem:[%s220_s25 + $0x8] sm:$0xff]  ;;  %v909_v3 = vld [vmem:[%s220_s25 + $0x18] sm:$0xff]  ;;  %v379_v32 = vlaneseq }
  0x3d   : > { %336 = vmatprep.mubr.f32.mxu0 %v750_v0  ;;  %624 = vset.pattern.permute.xlu1 %v751_v1  ;;  %v911_v4 = vld [vmem:[%s220_s25] sm:$0xff]  ;;  %v547_v5 = vpack.c.bf16 %v909_v3, %v907_v2  ;;  %v918_v6 = vld [vmem:[%s220_s25 + $0x10] sm:$0xff]  ;;  %v920_v7 = vld [vmem:[%s220_s25 + $0x28] sm:$0xff]  ;;  %vm268_vm0 = vcmask 261120   ;;  %s266_s6 = sld [smem:[#allocation2]]  ;;  %s546_s7 = sshll.u32 %s737_s20, 10 }
  0x3e   : > { %623 = vset.pattern.permute.xlu0 %v751_v1  ;;  %s252_s11 = scalar_select %p251_p9, %s737_s20, 1  ;;  %v922_v8 = vld [vmem:[%s220_s25 + $0x38] sm:$0xff]  ;;  %v549_v9 = vpack.c.bf16 %v918_v6, %v911_v4  ;;  %v261_v11 = vld [vmem:[%s220_s25 + $0x20] sm:$0xff]  ;;  %v263_v12 = vld [vmem:[%s220_s25 + $0x30] sm:$0xff]  ;;  %v380_v33 = vshrl.u32 %v379_v32, 7 }
  0x3f   : > { %v551_v10 = vpack.c.bf16 %v922_v8, %v920_v7  ;;  %548 = vmatprep.subr.bf16.mxu0 %v547_v5  ;;  %v553_v15 = vpack.c.bf16 %v263_v12, %v261_v11  ;;  %v265_v18 = vld [vmem:[%s996_s2] sm:$0x1]  ;;  %s249_s8 = scalar_lea.vmem [#allocation6], %s534_s3  ;;  %s939_s12 = scalar_lea.hbm %s998_s4, %s546_s7 }
  0x40   : > { %s545_s13 = sshll.u32 %s252_s11, 5  ;;  %550 = vmatpush1.bf16.msra.mxu0 %v549_v9  ;;  %v381_v36 = vsub.s32 0, %v380_v33  ;;  %s427_s9 = sshll.u32 %s249_s8, 4  ;;  %s941_s9 = int_to_ptr.vmem [resolvable:$true] %s427_s9 }
  0x41   : > { %s255_s28 = scalar_lea.vmem %s995_s1, %s545_s13  ;;  %552 = vmatprep.subr.bf16.mxu0 %v551_v10  ;;  %s412_s3 = scalar_lea.sflag [#allocation5], %s895_s16 }
  0x42   : > { %v357_v13 = vld [vmem:[%s255_s28 + $0x10] sm:$0xff]  ;;  %v355_v14 = vld [vmem:[%s255_s28] sm:$0xff]  ;;  %v358_v16 = vld [vmem:[%s255_s28 + $0x18] sm:$0xff]  ;;  %s663_s23 = scalar_lea.vmem %s941_s9, 1024  ;;  %p1006_p11 = scmp.ne.s32.totalorder %s1002_s29, 0 }
  0x43   : > { %371 = vperm.xlu1 %624, %v357_v13   ;;  %361 = vperm.xlu0 %623, %v355_v14   ;;  %v356_v17 = vld [vmem:[%s255_s28 + $0x8] sm:$0xff]  ;;  %v267_v19 = vstv %s266_s6  ;;  %p664_p8 = scmp.ne.s32.totalorder %s941_s9, %s663_s23  ;;  %s752_s25 = smov [#allocation6]  }
  0x44   : > { %554 = vmatpush1.bf16.msra.mxu0 %v553_v15  ;;  %s667_s11 = sshll.u32 %s752_s25, 4  ;;  %s668_s11 = int_to_ptr.vmem [resolvable:$false] %s667_s11 }
  0x45   : > { %p665_p0 = pnand %p664_p8, %p1006_p11  ;;  %s669_s13 = scalar_lea.vmem %s668_s11, 2048 }
  0x46   : > { %p670_p13 = scmp.lt.s32.totalorder %s941_s9, %s668_s11  ;;  %p671_p2 = scmp.lt.s32.totalorder %s669_s13, %s663_s23 }
  0x47   : > { %376 = vperm.xlu1 %624, %v358_v16   ;;  %366 = vperm.xlu0 %623, %v356_v17   ;;  %p666_p6 = pneg %p665_p0 }
  0x48   : > { %538 = vmatmul.mubr.msk.f32.vlgmr.msra.gmra.mrb[0].mxu0 %vm268_vm0, %v265_v18  ;;  %p672_p5 = por %p671_p2, %p670_p13 }
  0x4a   : > { %p673_p4 = pnand %p672_p5, %p666_p6 }
  0xc2   : > { %v372_v34 = vpop.permute.xlu1 %371  ;;  %v362_v35 = vpop.permute.xlu0 %361 }
  0xc6   : > { %v377_v41 = vpop.permute.xlu1 %376  ;;  %v367_v42 = vpop.permute.xlu0 %366 }
 0x11b   : > { %v338_v20 = vpop.f32.mrb[0].mxu0 }
 0x11c   : > { %v339_v21 = vadd.f32 %v338_v20, %v267_v19  ;;  %v340_v22 = vpop.f32.mrb[1].mxu0 }
 0x11d   : > { %v341_v23 = vadd.f32 %v340_v22, %v267_v19 }
 0x11e   : > { %v343_v24 = vsub.f32 0.0, %v339_v21 }
 0x11f   : > { %v344_v25 = vsub.f32 0.0, %v341_v23 }
 0x120   : > { %v345_v26 = vmul.f32 1.442695, %v343_v24 }
 0x121   : > { %v347_v27 = vmul.f32 1.442695, %v344_v25 }
 0x122   : > { %625 = vpow2.f32 %v345_v26 }
 0x123   : > { %627 = vpow2.f32 %v347_v27 }
 0x12c   : > { %v626_v28 = vpop.eup %625 }
 0x12d   : > { %v628_v29 = vpop.eup %627  ;;  %v349_v30 = vadd.f32 1.0, %v626_v28 }
 0x12e   : > { %v350_v31 = vadd.f32 1.0, %v628_v29 }
 0x12f   : > { %629 = vrcp.f32 %v349_v30 }
 0x130   : > { %631 = vrcp.f32 %v350_v31 }
 0x139   : > { %v630_v37 = vpop.eup %629 }
 0x13a   : > { %v632_v38 = vpop.eup %631  ;;  %v382_v39 = vrot.slane %v630_v37, %v381_v36 }
 0x13b   : > { %v386_v40 = vrot.slane %v632_v38, %v381_v36 }
 0x13c   : > { %v391_v43 = vadd.f32 %v382_v39, %v372_v34  ;;  %v387_v44 = vadd.f32 %v382_v39, %v362_v35  ;;  %v393_v45 = vadd.f32 %v382_v39, %v377_v41  ;;  %v389_v46 = vadd.f32 %v382_v39, %v367_v42 }
 0x13d   : > { %v392_v47 = vadd.f32 %v386_v40, %v372_v34  ;;  %v388_v48 = vadd.f32 %v386_v40, %v362_v35  ;;  %v394_v49 = vadd.f32 %v386_v40, %v377_v41  ;;  %v390_v50 = vadd.f32 %v386_v40, %v367_v42 }
 0x13e   : > { %v399_v51 = vmul.f32 %v391_v43, %v261_v11  ;;  %v395_v52 = vmul.f32 %v387_v44, %v911_v4  ;;  %v401_v53 = vmul.f32 %v393_v45, %v263_v12  ;;  %v397_v54 = vmul.f32 %v389_v46, %v918_v6 }
 0x13f   : > { %v400_v55 = vmul.f32 %v392_v47, %v920_v7  ;;  %v396_v56 = vmul.f32 %v388_v48, %v907_v2  ;;  %v402_v57 = vmul.f32 %v394_v49, %v922_v8  ;;  %v398_v58 = vmul.f32 %v390_v50, %v909_v3 }
 0x140   : > { %407 = vst [vmem:[%s249_s8 + $0x20] sm:$0xff] %v399_v51  ;;  %403 = vst [vmem:[%s249_s8] sm:$0xff] %v395_v52 }
 0x141   : > { %409 = vst [vmem:[%s249_s8 + $0x30] sm:$0xff] %v401_v53  ;;  %405 = vst [vmem:[%s249_s8 + $0x10] sm:$0xff] %v397_v54 }
 0x142   : > { %408 = vst [vmem:[%s249_s8 + $0x28] sm:$0xff] %v400_v55  ;;  %404 = vst [vmem:[%s249_s8 + $0x8] sm:$0xff] %v396_v56 }
 0x143   : > { %410 = vst [vmem:[%s249_s8 + $0x38] sm:$0xff] %v402_v57  ;;  %406 = vst [vmem:[%s249_s8 + $0x18] sm:$0xff] %v398_v58 }
 0x144   : > { %676 = shalt.err (!%p673_p4)
}
 0x145   : > { %s677_s14 = scalar_lea.hbm %s939_s12, 1024  ;;  %s681_s26 = scalar_lea.hbm %s998_s4, 2048 }
 0x146   : > { %p678_p7 = scmp.ne.s32.totalorder %s939_s12, %s677_s14  ;;  %p682_p1 = scmp.lt.u32.totalorder %s939_s12, %s998_s4 }
 0x147   : > { %p683_p3 = scmp.lt.u32.totalorder %s681_s26, %s677_s14  ;;  %p685_p8 = scmp.lt.u32.totalorder %s677_s14, %s939_s12 }
 0x148   : > { %p679_p10 = pnand %p678_p7, %p1006_p11 }
 0x149   : > { %p684_p9 = por %p683_p3, %p682_p1 }
 0x14a   : > { %p680_p12 = pneg %p679_p10 }
 0x14b   : > { %p686_p0 = por %p685_p8, %p684_p9 }
 0x14d   : > { %p687_p6 = pnand %p686_p0, %p680_p12 }
 0x14f   : > { %690 = shalt.err (!%p687_p6)
}
 0x150   : > { %s753_s7 = smov 256   ;;  %s754_s8 = smov 16  }
 0x151   : > { %557 = dma.vmem_to_hbm [thread:$0]  (%p1006_p11), %s941_s9, 1024, %s939_s12, %s412_s3, %s753_s7, %s753_s7, %s754_s8  }
 0x152 PF: > { %s442_s10 = sand.u32 1, %s725_s17   ;;  %p1007_p13 = scmp.ne.s32.totalorder %s1003_s5, 0 }
 0x153   : > { %p1008_p2 = scmp.ge.s32.totalorder %s745_s22, 2  ;;  %s443_s20 = scalar_lea.sflag [#allocation5], %s442_s10 }
 0x155   : > { %p564_p5 = pnand %p1008_p2, %p1007_p13 }
 0x157   : > { %720 = dma.done.wait (!%p564_p5), %s443_s20, 1024  }
 0x158   : > { %722 = vsyncadd (!%p564_p5), %s443_s20, 4294966272  ;;  %s21_s22 = sadd.s32 1, %s745_s22   ;;  %s1009_s17 = smov %s729_s18 }
 0x159   : > { %p18_p4 = scmp.ge.s32.totalorder %s21_s22, 4   ;;  %s1010_s18 = smov %s733_s19 }
 0x15a   : > { %s1011_s19 = smov %s839_s30  ;;  %s1012_s20 = smov %s741_s21 }
 0x15b   : > { %s1013_s21 = smov %s1015_s24  ;;  %20 = sbr.rel (!%p18_p4) target bundleno = 8 (0x8), region = 84 }
 0x162   :  { %448 = vsyncpa [#allocation4], 1 }
 0x163   :  { %450 = vsyncpa [#allocation4 + $0x1], 1 }
 0x164   :  { %451 = vsyncpa [#allocation5], 1 }
 0x165   :  { %453 = vsyncpa [#allocation5 + $0x1], 1 }

</bundles_post_ra>
